<compile_context>
chip_gen: v7x
topology: tpu7x:2x2x1
jax: 0.10.0
libtpu: 0.0.40
codegen_flags: <defaults>
</compile_context>

<pallas_src>
import functools

import jax
import jax.numpy as jnp
from jax import lax
from jax.experimental import pallas as pl
from jax.experimental.pallas import tpu as pltpu

LN_EPS = 1e-5


def _round_up(x, m):
    return (x + m - 1) // m * m


def _cdiv(a, b):
    return (a + b - 1) // b


def _vmem_capacity_bytes():
    try:
        return int(pltpu.get_tpu_info().vmem_capacity_bytes)
    except Exception:
        return 64 << 20  # conservative fallback = v7x per-TensorCore VMEM


def _linear_encoder_kernel(x_ref, w_ref, b_ref, o_ref, xn_ref):
    """Fused LayerNorm + Linear tile.

    x_ref:  (tm, D)   row tile of the flattened (B*L, D) input
    w_ref:  (tn, D)   output-N slice of the gamma-folded weight (PyTorch (out, in) layout)
    b_ref:  (1, tn)   output-N slice of the beta-folded bias (f32)
    o_ref:  (tm, tn)  output tile
    xn_ref: (tm, D)   VMEM scratch holding the normalized rows in MXU dtype (bf16)
    """
    # LayerNorm once per row tile: the N axis is the inner ("arbitrary") grid dim.
    @pl.when(pl.program_id(1) == 0)
    def _():
        x = x_ref[...].astype(jnp.float32)
        inv_d = jnp.float32(1.0 / x.shape[-1])
        mean = jnp.sum(x, axis=-1, keepdims=True) * inv_d
        xc = x - mean
        var = jnp.sum(xc * xc, axis=-1, keepdims=True) * inv_d
        inv = lax.rsqrt(var + jnp.float32(LN_EPS))
        xn_ref[...] = (xc * inv).astype(xn_ref.dtype)  # gamma/beta already folded into W'/b'

    # y = xn @ W'^T + b'  : contract dim 1 of the (out, in) weight directly (no transpose),
    # bf16 MXU inputs with f32 accumulation.
    y = lax.dot_general(
        xn_ref[...], w_ref[...],
        dimension_numbers=(((1,), (1,)), ((), ())),
        preferred_element_type=jnp.float32)
    y = y + b_ref[...].astype(jnp.float32)
    o_ref[...] = y.astype(o_ref.dtype)


@functools.partial(jax.jit, static_argnames=("tm", "tn", "mxu_dtype"))
def linear_encoder(inputs_embeds, ln_weight, ln_bias, lin_weight, lin_bias,
                   *, tm=None, tn=None, mxu_dtype=jnp.bfloat16):
    """Pallas implementation of LinearEncoder.forward.

    inputs_embeds: (B, L, D)
    ln_weight, ln_bias: (D,)
    lin_weight: (D, D)  -- PyTorch convention: out = x @ lin_weight.T + lin_bias
    lin_bias: (D,)
    Returns: (B, L, D) array == results_obj.last_hidden_state
    """
    B, L, D = inputs_embeds.shape
    rows = B * L
    f32 = jnp.float32

    # Fold the LayerNorm affine into the Linear weight/bias (O(D^2), negligible vs the matmul):
    #   ((x - mean)*inv*gamma + beta) @ W^T + b = ((x - mean)*inv) @ (W*gamma)^T + (W @ beta + b)
    w_eff = lin_weight.astype(f32) * ln_weight.astype(f32)[None, :]            # (D_out, D_in)
    b_eff = (lin_bias.astype(f32)
             + lin_weight.astype(f32) @ ln_bias.astype(f32)).reshape(1, D)     # (1, D) f32
    w_mxu = w_eff.astype(mxu_dtype)                                            # bf16 MXU feed

    # ----- tile sizes -----
    w_it = jnp.dtype(mxu_dtype).itemsize
    if tm is None:
        tm = 512 if D <= 1024 else 256       # bigger row tiles when D is small (DMA-bound)
    tm = max(8, _round_up(tm, 8))
    if tn is None:
        # Keep the whole weight resident when small; otherwise tile the output-N dimension.
        tn = D if D * D * w_it <= (8 << 20) else 512
    if tn >= D:
        tn = D
    else:
        tn = max(128, (tn // 128) * 128)     # lane-aligned N tiles

    rows_p = _round_up(rows, 8)
    tm_eff = min(tm, rows_p)
    if rows_p >= 16:
        # Guarantee >= 2 row tiles so the 'parallel' axis can shard across both v7x TensorCores.
        tm_eff = min(tm_eff, _round_up(_cdiv(rows_p, 2), 8))

    grid = (_cdiv(rows_p, tm_eff), _cdiv(D, tn))

    x2d = inputs_embeds.reshape(rows, D)
    if rows_p != rows:
        x2d = jnp.pad(x2d, ((0, rows_p - rows), (0, 0)))

    # ----- VMEM budget: double-buffered tiles + scratch + live f32 LayerNorm temporaries -----
    x_it = jnp.dtype(inputs_embeds.dtype).itemsize
    needed = (2 * tm_eff * D * x_it          # input row tiles (double-buffered)
              + 2 * tm_eff * tn * x_it       # output tiles (double-buffered)
              + 2 * tn * D * w_it            # weight N-slices (double-buffered)
              + 2 * tn * 4                   # bias slices
              + tm_eff * D * w_it            # xn scratch
              + 6 * tm_eff * D * 4)          # f32 intermediates (x, xc, xn, y, ...)
    cap = _vmem_capacity_bytes()
    vmem_bytes = int(min(max(needed + (2 << 20), 32 << 20), int(0.85 * cap)))

    out = pl.pallas_call(
        _linear_encoder_kernel,
        out_shape=jax.ShapeDtypeStruct((rows_p, D), inputs_embeds.dtype),
        grid_spec=pltpu.PrefetchScalarGridSpec(
            num_scalar_prefetch=0,
            grid=grid,
            in_specs=[
                pl.BlockSpec((tm_eff, D), lambda i, j: (i, 0)),   # x row tile
                pl.BlockSpec((tn, D), lambda i, j: (j, 0)),       # weight N-slice (out, in)
                pl.BlockSpec((1, tn), lambda i, j: (0, j)),       # bias N-slice
            ],
            out_specs=pl.BlockSpec((tm_eff, tn), lambda i, j: (i, j)),
            scratch_shapes=[pltpu.VMEM((tm_eff, D), mxu_dtype)],
        ),
        compiler_params=pltpu.CompilerParams(
            dimension_semantics=("parallel", "arbitrary"),
            vmem_limit_bytes=vmem_bytes,
        ),
    )(x2d, w_mxu, b_eff)

    # TODO(synk): Results_Obj is a stateful Python container; we return last_hidden_state directly.
    return out[:rows].reshape(B, L, D)


def _reference(inputs_embeds, ln_weight, ln_bias, lin_weight, lin_bias):
    x = inputs_embeds.astype(jnp.float32)
    mean = jnp.mean(x, axis=-1, keepdims=True)
    var = jnp.mean((x - mean) ** 2, axis=-1, keepdims=True)
    xn = (x - mean) / jnp.sqrt(var + LN_EPS)
    xn = xn * ln_weight + ln_bias
    return xn @ lin_weight.T + lin_bias


if __name__ == "__main__":
    # config.d_model -> small synthetic value
    B, L, D = 2, 8, 32

    key = jax.random.PRNGKey(0)
    k_x, k_w, k_b, k_g, k_bt = jax.random.split(key, 5)

    inputs_embeds = jax.random.normal(k_x, (B, L, D), dtype=jnp.float32)

    # LayerNorm params (module default is weight=1 / bias=0; perturb slightly so the
    # gamma/beta folding path is actually exercised).
    ln_weight = 1.0 + 0.05 * jax.random.normal(k_g, (D,), dtype=jnp.float32)
    ln_bias = 0.05 * jax.random.normal(k_bt, (D,), dtype=jnp.float32)

    # Linear init (deterministic, PyTorch-like uniform range)
    bound = 1.0 / jnp.sqrt(jnp.float32(D))
    lin_weight = jax.random.uniform(k_w, (D, D), minval=-bound, maxval=bound, dtype=jnp.float32)
    lin_bias = jax.random.uniform(k_b, (D,), minval=-bound, maxval=bound, dtype=jnp.float32)

    out = linear_encoder(inputs_embeds, ln_weight, ln_bias, lin_weight, lin_bias)
    out = jax.block_until_ready(out)

    ref = _reference(inputs_embeds, ln_weight, ln_bias, lin_weight, lin_bias)
    assert out.shape == (B, L, D)
    # bf16 MXU inputs (f32 accumulation) -> compare against the pure-f32 reference with a
    # correspondingly relaxed tolerance.
    max_err = float(jnp.max(jnp.abs(out - ref)))
    assert jnp.allclose(out, ref, atol=5e-2, rtol=5e-2), f"mismatch vs reference (max err {max_err})"

    print("KERNEL_OK")
</pallas_src>

<mosaic_0001>
module attributes {stable_mosaic.version = 11 : i64} {
  func.func @_linear_encoder_kernel(%arg0: i32, %arg1: i32, %arg2: memref<8x32xf32, #tpu.memory_space<vmem>>, %arg3: memref<32x32xbf16, #tpu.memory_space<vmem>>, %arg4: memref<1x32xf32, #tpu.memory_space<vmem>>, %arg5: memref<8x32xf32, #tpu.memory_space<vmem>>, %arg6: memref<8x32xbf16, #tpu.memory_space<vmem>>) attributes {dimension_semantics = [#tpu.dimension_semantics<parallel>, #tpu.dimension_semantics<arbitrary>], iteration_bounds = array<i64: 2, 1>, scalar_prefetch = 0 : i64, scratch_operands = 1 : i64, tpu.core_type = #tpu.core_type<tc>, window_params = [{transform_indices = @transform_0, window_bounds = array<i64: 8, 32>}, {transform_indices = @transform_1, window_bounds = array<i64: 32, 32>}, {transform_indices = @transform_2, window_bounds = array<i64: 1, 32>}, {transform_indices = @transform_3, window_bounds = array<i64: 8, 32>}]} {
    %c0_i32 = arith.constant 0 : i32
    %0 = arith.cmpi eq, %arg1, %c0_i32 : i32
    %1 = arith.extui %0 : i1 to i32
    %c0_i32_0 = arith.constant 0 : i32
    %2 = arith.cmpi ne, %1, %c0_i32_0 : i32
    scf.if %2 {
      %c0_8 = arith.constant 0 : index
      %c0_9 = arith.constant 0 : index
      %10 = vector.load %arg2[%c0_8, %c0_9] : memref<8x32xf32, #tpu.memory_space<vmem>>, vector<8x32xf32>
      %cst_10 = arith.constant dense<0.000000e+00> : vector<8xf32>
      %11 = vector.multi_reduction <add>, %10, %cst_10 [1] : vector<8x32xf32> to vector<8xf32>
      %12 = vector.shape_cast %11 : vector<8xf32> to vector<8x1xf32>
      %cst_11 = arith.constant 3.125000e-02 : f32
      %13 = vector.broadcast %cst_11 : f32 to vector<8x1xf32>
      %14 = arith.mulf %12, %13 : vector<8x1xf32>
      %15 = vector.broadcast %14 : vector<8x1xf32> to vector<8x32xf32>
      %16 = arith.subf %10, %15 : vector<8x32xf32>
      %17 = arith.mulf %16, %16 : vector<8x32xf32>
      %cst_12 = arith.constant dense<0.000000e+00> : vector<8xf32>
      %18 = vector.multi_reduction <add>, %17, %cst_12 [1] : vector<8x32xf32> to vector<8xf32>
      %19 = vector.shape_cast %18 : vector<8xf32> to vector<8x1xf32>
      %cst_13 = arith.constant 3.125000e-02 : f32
      %20 = vector.broadcast %cst_13 : f32 to vector<8x1xf32>
      %21 = arith.mulf %19, %20 : vector<8x1xf32>
      %cst_14 = arith.constant 9.99999974E-6 : f32
      %22 = vector.broadcast %cst_14 : f32 to vector<8x1xf32>
      %23 = arith.addf %21, %22 : vector<8x1xf32>
      %24 = math.rsqrt %23 : vector<8x1xf32>
      %25 = vector.broadcast %24 : vector<8x1xf32> to vector<8x32xf32>
      %26 = arith.mulf %16, %25 : vector<8x32xf32>
      %27 = arith.truncf %26 : vector<8x32xf32> to vector<8x32xbf16>
      %c0_15 = arith.constant 0 : index
      %c0_16 = arith.constant 0 : index
      %28 = vector.load %arg6[%c0_15, %c0_16] : memref<8x32xbf16, #tpu.memory_space<vmem>>, vector<8x32xbf16>
      tpu.vector_store %arg6[%c0_15, %c0_16], %27 {strides = array<i32>} : memref<8x32xbf16, #tpu.memory_space<vmem>>, vector<8x32xbf16>,
    } else {
    }
    %c0 = arith.constant 0 : index
    %c0_1 = arith.constant 0 : index
    %3 = vector.load %arg6[%c0, %c0_1] : memref<8x32xbf16, #tpu.memory_space<vmem>>, vector<8x32xbf16>
    %c0_2 = arith.constant 0 : index
    %c0_3 = arith.constant 0 : index
    %4 = vector.load %arg3[%c0_2, %c0_3] : memref<32x32xbf16, #tpu.memory_space<vmem>>, vector<32x32xbf16>
    %cst = arith.constant dense<0.000000e+00> : vector<8x32xf32>
    %5 = tpu.matmul %3, %4, %cst {dimension_numbers = #tpu.dot_dimension_numbers<[1], [1], [0], [0], [0, 0, 1, 0], [], []>} : vector<8x32xbf16>, vector<32x32xbf16>, vector<8x32xf32> -> vector<8x32xf32>
    %c0_4 = arith.constant 0 : index
    %c0_5 = arith.constant 0 : index
    %6 = vector.load %arg4[%c0_4, %c0_5] : memref<1x32xf32, #tpu.memory_space<vmem>>, vector<1x32xf32>
    %7 = vector.broadcast %6 : vector<1x32xf32> to vector<8x32xf32>
    %8 = arith.addf %5, %7 : vector<8x32xf32>
    %c0_6 = arith.constant 0 : index
    %c0_7 = arith.constant 0 : index
    %9 = vector.load %arg5[%c0_6, %c0_7] : memref<8x32xf32, #tpu.memory_space<vmem>>, vector<8x32xf32>
    tpu.vector_store %arg5[%c0_6, %c0_7], %8 {strides = array<i32>} : memref<8x32xf32, #tpu.memory_space<vmem>>, vector<8x32xf32>,
    return
  }
  func.func @transform_0(%arg0: i32, %arg1: i32) -> (i32, i32) {
    %c0_i32 = arith.constant 0 : i32
    %c0_i32_0 = arith.constant 0 : i32
    return %arg0, %c0_i32 : i32, i32
  }
  func.func @transform_1(%arg0: i32, %arg1: i32) -> (i32, i32) {
    %c0_i32 = arith.constant 0 : i32
    %c0_i32_0 = arith.constant 0 : i32
    return %arg1, %c0_i32 : i32, i32
  }
  func.func @transform_2(%arg0: i32, %arg1: i32) -> (i32, i32) {
    %c0_i32 = arith.constant 0 : i32
    %c0_i32_0 = arith.constant 0 : i32
    return %c0_i32, %arg1 : i32, i32
  }
  func.func @transform_3(%arg0: i32, %arg1: i32) -> (i32, i32) {
    %c0_i32 = arith.constant 0 : i32
    return %arg0, %arg1 : i32, i32
  }
}

</mosaic_0001>

<bundles_post_ra>
// kernel: linear_encoder.1
= control target key start
LH: loop header
LB: loop body
LE: loop exit
PB: predicated region body
PF: predicated region fallthrough
CT: control target
= control target key end

     0   :  { %8 = vsyncpa [#allocation4], 0  ;;  %s741_s0 = inlined_call_operand.vmem [shape: f32[16,32], index: 0, kind: input, shape index: {}]   ;;  %s742_s1 = inlined_call_operand.vmem [shape: bf16[32,32], index: 1, kind: input, shape index: {}]   ;;  %s743_s2 = inlined_call_operand.vmem [shape: f32[1,32], index: 2, kind: input, shape index: {}]   ;;  %s744_s3 = inlined_call_operand.hbm [shape: f32[16,32], index: 3, kind: output, shape index: {}]  }
   0x1   :  { %10 = vsyncpa [#allocation4 + $0x1], 0  ;;  %s614_s12 = smov 0   ;;  %s616_s13 = smov 0  }
   0x2   :  { %s618_s14 = smov 0   ;;  %s620_s15 = smov 0  }
   0x3   :  { %s622_s16 = smov 0   ;;  %s624_s17 = smov 0  }
   0x4 LB: > { %s422_s18 = sadd.s32 4294967295, %s589_s17   ;;  %s423_s19 = sadd.s32 4294967294, %s589_s17   ;;  %s589_s17 = sphi %s624_s17, %s16_s17   ;;  %s585_s16 = sphi %s622_s16, %s751_s16   ;;  %s581_s15 = sphi %s620_s15, %s750_s15   ;;  %s577_s14 = sphi %s618_s14, %s749_s14   ;;  %s573_s13 = sphi %s616_s13, %s748_s13   ;;  %s569_s12 = sphi %s614_s12, %s747_s12  }
   0x5   : > { %s28_s20 = sadd.s32 1, %s585_s16  ;;  %s115_s21 = sadd.s32 1, %s577_s14 }
   0x6   : > { %p30_p0 = scmp.ge.s32.totalorder %s28_s20, 2  ;;  %p125_p1 = scmp.ne.s32.totalorder %s577_s14, %s573_s13 }
   0x7   : > { %p126_p2 = scmp.eq.s32.totalorder %s422_s18, 1  ;;  %p131_p3 = scmp.ne.s32.totalorder %s573_s13, %s569_s12 }
   0x8   : > { %s753_s20 = smov (%p30_p0, %s28_s20), 0  ;;  %p132_p5 = scmp.eq.s32.totalorder %s423_s19, 1 }
   0x9   : > { %p654_p4 = por %p126_p2, %p125_p1  ;;  %s110_s23 = ssub.s32 %s585_s16, %s753_s20 }
   0xa   : > { %p428_p6 = scmp.ge.s32.totalorder %s589_s17, 1  ;;  %p113_p7 = scmp.eq.s32.totalorder %s110_s23, 0 }
   0xb   : > { %p661_p8 = por %p132_p5, %p131_p3  ;;  %p172_p9 = scmp.lt.s32.totalorder %s589_s17, 3 }
   0xc   : > { %s667_s25 = scalar_select %p113_p7, %s577_s14, %s115_s21  }
   0xd   : > { %p173_p10 = pnand %p428_p6, %p172_p9 }
   0xe   : > { %p203_p11 = scmp.lt.s32.totalorder (!%p173_p10), %s581_s15, 1  ;;  %vm222_vm0 = vcmask (!%p173_p10), 261120   ;;  %v507_v7 = vld [vmem:[%s742_s1] sm:$0xff] (!%p173_p10)   ;;  %v591_v8 = vmov (!%p173_p10), 0.0   ;;  %v508_v10 = vld [vmem:[%s742_s1 + $0x8] sm:$0xff] (!%p173_p10)   ;;  %vm592_vm1 = vmmov (!%p173_p10), 0  }
   0xf   : > { %176 = sbr.rel (%p173_p10) target bundleno = 574 (0x23e), region = 32  ;;  %442 = vmatprep.subr.bf16.mxu0 (!%p173_p10), %v591_v8  ;;  %v266_v9 = vsel (!%p173_p10), %vm222_vm0, %v507_v7, 0  ;;  %v269_v11 = vsel (!%p173_p10), %vm222_vm0, %v508_v10, 0  ;;  %446 = vmatprep.mubr.msk.bf16.mxu0 (!%p173_p10), %vm592_vm1, %v591_v8  ;;  %vm237_vm2 = vcmask (!%p173_p10), 257024   ;;  %s200_s8 = sand.u32 (!%p173_p10), 1, %s573_s13  }
  0x10   : > { %443 = vmatpush3.bf16.xpose.msra.mxu0 (!%p173_p10), %v266_v9  ;;  %s429_s9 = sshll.u32 (!%p173_p10), %s200_s8, 3  ;;  %v431_v19 = vld [vmem:[%s743_s2] ss:$0 sm:$0xff] (!%p173_p10)  ;;  %s436_s18 = sshll.u32 (!%p173_p10), %s581_s15, 7 }
  0x11   : > { %444 = vmatprep.subr.bf16.mxu0 (!%p173_p10), %v591_v8  ;;  %s202_s19 = scalar_lea.vmem (!%p173_p10), [#allocation3], %s429_s9  ;;  %s593_s29 = smov (!%p173_p10), [#allocation3]  }
  0x12   : > { %s327_s21 = sshll.u32 (!%p173_p10), %s202_s19, 4  ;;  %s695_s21 = int_to_ptr.vmem [resolvable:$true] %s327_s21 }
  0x13   : > { %s511_s28 = scalar_lea.vmem (!%p173_p10), %s695_s21, 128 }
  0x14   : > { %p512_p12 = scmp.ne.s32.totalorder (!%p173_p10), %s695_s21, %s511_s28 }
  0x16   : > { %s204_s26 = scalar_select %p203_p11, %s581_s15, 1 }
  0x17   : > { %s313_s15 = scalar_lea.sflag [#allocation4], %s200_s8  ;;  %p513_p13 = pnand %p512_p12, %p654_p4 }
  0x18   : > { %s430_s27 = sshll.u32 %s204_s26, 3  ;;  %445 = vmatpush3.bf16.xpose.msra.mxu0 %v269_v11 }
  0x19   : > { %s206_s30 = scalar_lea.vmem %s741_s0, %s430_s27  ;;  %s693_s27 = scalar_lea.hbm %s744_s3, %s436_s18 }
  0x1a   : > { %v221_v0 = vld [vmem:[%s206_s30] sm:$0xff]  ;;  %p514_p0 = pneg %p513_p13  ;;  %s515_s30 = sshll.u32 %s593_s29, 4  ;;  %s516_s30 = int_to_ptr.vmem [resolvable:$false] %s515_s30 }
  0x1b   : > { %v223_v1 = vsel %vm222_vm0, %v221_v0, 0.0  ;;  %s517_s4 = scalar_lea.vmem %s516_s30, 256  ;;  %p518_p1 = scmp.lt.s32.totalorder %s695_s21, %s516_s30 }
  0x1c   : > { %224 = vadd.xlane.f32.xlu0 %v223_v1  ;;  %p519_p2 = scmp.lt.s32.totalorder %s517_s4, %s511_s28 }
  0x1e   : > { %p520_p3 = por %p519_p2, %p518_p1 }
  0x20   : > { %p521_p5 = pnand %p520_p3, %p514_p0 }
  0xa9   : > { %v225_v2 = vpop.xlane.xlu0 %224 }
  0xaa   : > { %v226_v3 = vmul.f32 0.03125, %v225_v2 }
  0xac   : > { %v227_v4 = vsub.f32 %v221_v0, %v226_v3 }
  0xae   : > { %v228_v5 = vmul.f32 %v227_v4, %v227_v4 }
  0xb0   : > { %v229_v6 = vsel %vm222_vm0, %v228_v5, 0.0 }
  0xb1   : > { %230 = vadd.xlane.f32.xlu0 %v229_v6 }
 0x13e   : > { %v231_v12 = vpop.xlane.xlu0 %230 }
 0x13f   : > { %v232_v13 = vmul.f32 0.03125, %v231_v12 }
 0x141   : > { %v233_v14 = vadd.f32 1e-05, %v232_v13 }
 0x143   : > { %509 = vrsqrt.f32 %v233_v14 }
 0x14d   : > { %v510_v15 = vpop.eup %509 }
 0x14e   : > { %v235_v16 = vmul.f32 %v510_v15, %v227_v4 }
 0x150   : > { %v236_v17 = vpack.c.bf16 %v235_v16, %v235_v16 }
 0x152   : > { %238 = vst.msk [vmem:[#allocation2] sm:$0xf] %vm237_vm2, %v236_v17 }
 0x159   : > { %v239_v18 = vld [vmem:[#allocation2] sm:$0xf] }
 0x15a   : > { %447 = vmatmul.mubr.msk.bf16.vlgmr.msra.gmra.mrb[0].mxu0 %vm222_vm0, %v239_v18 }
 0x22d   : > { %v305_v20 = vpop.f32.mrb[0].mxu0 }
 0x22e   : > { %v306_v21 = vadd.f32 %v431_v19, %v305_v20  ;;  %v448_v22 = vpop.f32.mrb[1].mxu0 }
 0x22f   : > { %v308_v23 = vpop.f32.mrb[2].mxu0 }
 0x230   : > { %v449_v24 = vpop.f32.mrb[3].mxu0  ;;  %311 = vst.msk [vmem:[%s202_s19] sm:$0xff] %vm222_vm0, %v306_v21 }
 0x231   : > { %524 = shalt.err (!%p521_p5)
}
 0x232   : > { %s525_s5 = scalar_lea.hbm %s693_s27, 128  ;;  %s529_s8 = scalar_lea.hbm %s744_s3, 256 }
 0x233   : > { %p526_p6 = scmp.ne.s32.totalorder %s693_s27, %s525_s5  ;;  %p530_p10 = scmp.lt.u32.totalorder %s693_s27, %s744_s3 }
 0x234   : > { %p531_p11 = scmp.lt.u32.totalorder %s529_s8, %s525_s5  ;;  %p533_p13 = scmp.lt.u32.totalorder %s525_s5, %s693_s27 }
 0x235   : > { %p527_p7 = pnand %p526_p6, %p654_p4 }
 0x236   : > { %p532_p12 = por %p531_p11, %p530_p10 }
 0x237   : > { %p528_p9 = pneg %p527_p7 }
 0x238   : > { %p534_p0 = por %p533_p13, %p532_p12 }
 0x23a   : > { %p535_p1 = pnand %p534_p0, %p528_p9 }
 0x23c   : > { %538 = shalt.err (!%p535_p1)
}
 0x23d   : > { %450 = dma.vmem_to_hbm [thread:$0]  (%p654_p4), %s695_s21, 128, %s693_s27, %s313_s15  }
 0x23e PF: > { %p456_p2 = scmp.ge.s32.totalorder %s589_s17, 2  ;;  %s339_s11 = sand.u32 1, %s569_s12  }
 0x23f   : > { %s340_s18 = scalar_lea.sflag [#allocation4], %s339_s11 }
 0x240   : > { %p453_p3 = pnand %p456_p2, %p661_p8 }
 0x242   : > { %564 = dma.done.wait (!%p453_p3), %s340_s18, 128  }
 0x243   : > { %566 = vsyncadd (!%p453_p3), %s340_s18, 4294967168  ;;  %s16_s17 = sadd.s32 1, %s589_s17   ;;  %s747_s12 = smov %s573_s13 }
 0x244   : > { %p13_p5 = scmp.ge.s32.totalorder %s16_s17, 4   ;;  %s748_s13 = smov %s577_s14 }
 0x245   : > { %s749_s14 = smov %s667_s25  ;;  %s750_s15 = smov %s585_s16 }
 0x246   : > { %s751_s16 = smov %s753_s20  ;;  %15 = sbr.rel (!%p13_p5) target bundleno = 4 (0x4), region = 77 }
 0x24d   :  { %345 = vsyncpa [#allocation4], 1 }
 0x24e   :  { %347 = vsyncpa [#allocation4 + $0x1], 1 }

</bundles_post_ra>
